<compile_context>
chip_gen: v7x
topology: tpu7x:2x2x1
jax: 0.10.0
libtpu: 0.0.40
codegen_flags: <defaults>
</compile_context>

<pallas_src>
import jax
import jax.numpy as jnp
from jax.experimental import pallas as pl
from jax.experimental.pallas import tpu as pltpu


def _get_gradient_kernel(x_ref, o_ref):
    """x_ref: (NB, H, W) input planes, o_ref: (NB, H+2, W+2) f32 output."""
    x = x_ref[...].astype(jnp.float32)
    nb, h, w = x.shape

    # Vertical gradient (cross-correlation, matching F.conv2d with padding=2):
    #   v[y, x] = xp[y+2, x+1] - xp[y, x+1]
    # Nonzero only in output columns 1..W; inside that band it is a pure
    # row-shifted difference of the unpadded input.
    zr2 = jnp.zeros((nb, 2, w), jnp.float32)
    v_core = (jnp.concatenate([x, zr2], axis=1)        # x[y, :]   (y <  H)
              - jnp.concatenate([zr2, x], axis=1))     # x[y-2, :] (y >= 2)
    zc1 = jnp.zeros((nb, h + 2, 1), jnp.float32)
    v = jnp.concatenate([zc1, v_core, zc1], axis=2)    # (NB, H+2, W+2)

    # Horizontal gradient:
    #   g[y, x] = xp[y+1, x+2] - xp[y+1, x]
    # Nonzero only in output rows 1..H; column-shifted difference of x.
    zc2 = jnp.zeros((nb, h, 2), jnp.float32)
    g_core = (jnp.concatenate([x, zc2], axis=2)        # x[:, x]   (x <  W)
              - jnp.concatenate([zc2, x], axis=2))     # x[:, x-2] (x >= 2)
    zr1 = jnp.zeros((nb, 1, w + 2), jnp.float32)
    g = jnp.concatenate([zr1, g_core, zr1], axis=1)    # (NB, H+2, W+2)

    o_ref[...] = jnp.sqrt(v * v + g * g + 1e-6).astype(o_ref.dtype)


def _planes_per_block(n_planes, h, w, in_itemsize, budget_bytes=2 << 20):
    """Largest divisor of n_planes whose in+out block fits `budget_bytes`;
    prefers leaving >= 2 grid steps so both TensorCores can get work."""
    per_plane = h * w * in_itemsize + (h + 2) * (w + 2) * 4
    fitting = [d for d in range(1, n_planes + 1)
               if n_planes % d == 0 and d * per_plane <= budget_bytes]
    if not fitting:
        return 1
    multi_step = [d for d in fitting if n_planes // d >= 2]
    return max(multi_step) if multi_step else max(fitting)


def get_gradient(x):
    """x: (B, C>=3, H, W) float array. Returns (B, 3, H+2, W+2) float32."""
    B, C, H, W = x.shape
    assert C >= 3, "Get_gradient uses input channels 0, 1, 2"
    if C != 3:
        x = x[:, :3]
    Ho, Wo = H + 2, W + 2
    N = B * 3
    xf = x.reshape(N, H, W)            # contiguous reshape: no data movement

    itemsize = jnp.dtype(x.dtype).itemsize
    nb = _planes_per_block(N, H, W, itemsize)
    grid = (N // nb,)

    # VMEM budget: double-buffered in/out blocks plus in-kernel intermediates
    # (a handful of (H+2, W+2) f32 temporaries per plane), with headroom.
    block_io = nb * (H * W * itemsize + Ho * Wo * 4)
    intermediates = 10 * nb * Ho * Wo * 4
    vmem_limit = int(min(max(2 * block_io + intermediates, 32 << 20), 64 << 20))

    out = pl.pallas_call(
        _get_gradient_kernel,
        out_shape=jax.ShapeDtypeStruct((N, Ho, Wo), jnp.float32),
        grid=grid,
        in_specs=[pl.BlockSpec((nb, H, W), lambda i: (i, 0, 0))],
        out_specs=pl.BlockSpec((nb, Ho, Wo), lambda i: (i, 0, 0)),
        compiler_params=pltpu.CompilerParams(
            dimension_semantics=("parallel",),
            vmem_limit_bytes=vmem_limit,
        ),
    )(xf)
    return out.reshape(B, 3, Ho, Wo)


def _reference(x):
    """Pure-JAX replica of the PyTorch forward, used for verification."""
    kv = jnp.array([[0.0, -1.0, 0.0],
                    [0.0,  0.0, 0.0],
                    [0.0,  1.0, 0.0]], dtype=jnp.float32)
    kh = jnp.array([[ 0.0, 0.0, 0.0],
                    [-1.0, 0.0, 1.0],
                    [ 0.0, 0.0, 0.0]], dtype=jnp.float32)
    x = x[:, :3].astype(jnp.float32)
    B, C, H, W = x.shape
    Ho, Wo = H + 2, W + 2
    xp = jnp.pad(x, ((0, 0), (0, 0), (2, 2), (2, 2)))
    v = jnp.zeros((B, C, Ho, Wo), jnp.float32)
    h = jnp.zeros((B, C, Ho, Wo), jnp.float32)
    for ky in range(3):
        for kx in range(3):
            win = xp[:, :, ky:ky + Ho, kx:kx + Wo]
            v = v + kv[ky, kx] * win
            h = h + kh[ky, kx] * win
    return jnp.sqrt(v * v + h * h + 1e-6)


if __name__ == "__main__":
    key = jax.random.PRNGKey(0)
    x = jax.random.normal(key, (2, 3, 16, 16), dtype=jnp.float32)

    out = jax.block_until_ready(get_gradient(x))
    ref = _reference(x)

    assert out.shape == (2, 3, 18, 18), out.shape
    assert out.dtype == jnp.float32
    assert jnp.allclose(out, ref, atol=1e-5, rtol=1e-5), "mismatch vs reference"

    print("KERNEL_OK")
</pallas_src>

<mosaic_0001>
module attributes {stable_mosaic.version = 11 : i64} {
  func.func @_get_gradient_kernel(%arg0: i32, %arg1: memref<3x16x16xf32, #tpu.memory_space<vmem>>, %arg2: memref<3x18x18xf32, #tpu.memory_space<vmem>>) attributes {dimension_semantics = [#tpu.dimension_semantics<parallel>], iteration_bounds = array<i64: 2>, scalar_prefetch = 0 : i64, scratch_operands = 0 : i64, tpu.core_type = #tpu.core_type<tc>, window_params = [{transform_indices = @transform_0, window_bounds = array<i64: 3, 16, 16>}, {transform_indices = @transform_1, window_bounds = array<i64: 3, 18, 18>}]} {
    %c0 = arith.constant 0 : index
    %c0_0 = arith.constant 0 : index
    %c0_1 = arith.constant 0 : index
    %0 = vector.load %arg1[%c0, %c0_0, %c0_1] : memref<3x16x16xf32, #tpu.memory_space<vmem>>, vector<3x16x16xf32>
    %cst = arith.constant 0.000000e+00 : f32
    %1 = vector.broadcast %cst : f32 to vector<3x2x16xf32>
    %2 = tpu.concatenate %0, %1 in 1 : vector<3x16x16xf32>, vector<3x2x16xf32> -> vector<3x18x16xf32>
    %3 = tpu.concatenate %1, %0 in 1 : vector<3x2x16xf32>, vector<3x16x16xf32> -> vector<3x18x16xf32>
    %4 = arith.subf %2, %3 : vector<3x18x16xf32>
    %cst_2 = arith.constant 0.000000e+00 : f32
    %5 = vector.broadcast %cst_2 : f32 to vector<3x18x1xf32>
    %6 = tpu.concatenate %5, %4, %5 in 2 : vector<3x18x1xf32>, vector<3x18x16xf32>, vector<3x18x1xf32> -> vector<3x18x18xf32>
    %cst_3 = arith.constant 0.000000e+00 : f32
    %7 = vector.broadcast %cst_3 : f32 to vector<3x16x2xf32>
    %8 = tpu.concatenate %0, %7 in 2 : vector<3x16x16xf32>, vector<3x16x2xf32> -> vector<3x16x18xf32>
    %9 = tpu.concatenate %7, %0 in 2 : vector<3x16x2xf32>, vector<3x16x16xf32> -> vector<3x16x18xf32>
    %10 = arith.subf %8, %9 : vector<3x16x18xf32>
    %cst_4 = arith.constant 0.000000e+00 : f32
    %11 = vector.broadcast %cst_4 : f32 to vector<3x1x18xf32>
    %12 = tpu.concatenate %11, %10, %11 in 1 : vector<3x1x18xf32>, vector<3x16x18xf32>, vector<3x1x18xf32> -> vector<3x18x18xf32>
    %13 = arith.mulf %6, %6 : vector<3x18x18xf32>
    %14 = arith.mulf %12, %12 : vector<3x18x18xf32>
    %15 = arith.addf %13, %14 : vector<3x18x18xf32>
    %cst_5 = arith.constant 9.99999997E-7 : f32
    %16 = vector.broadcast %cst_5 : f32 to vector<3x18x18xf32>
    %17 = arith.addf %15, %16 : vector<3x18x18xf32>
    %18 = math.sqrt %17 : vector<3x18x18xf32>
    %c0_6 = arith.constant 0 : index
    %c0_7 = arith.constant 0 : index
    %c0_8 = arith.constant 0 : index
    %19 = vector.load %arg2[%c0_6, %c0_7, %c0_8] : memref<3x18x18xf32, #tpu.memory_space<vmem>>, vector<3x18x18xf32>
    tpu.vector_store %arg2[%c0_6, %c0_7, %c0_8], %18 {strides = array<i32>} : memref<3x18x18xf32, #tpu.memory_space<vmem>>, vector<3x18x18xf32>,
    return
  }
  func.func @transform_0(%arg0: i32) -> (i32, i32, i32) {
    %c0_i32 = arith.constant 0 : i32
    %c0_i32_0 = arith.constant 0 : i32
    %c0_i32_1 = arith.constant 0 : i32
    return %arg0, %c0_i32, %c0_i32_0 : i32, i32, i32
  }
  func.func @transform_1(%arg0: i32) -> (i32, i32, i32) {
    %c0_i32 = arith.constant 0 : i32
    %c0_i32_0 = arith.constant 0 : i32
    %c0_i32_1 = arith.constant 0 : i32
    return %arg0, %c0_i32, %c0_i32_0 : i32, i32, i32
  }
}

</mosaic_0001>

<bundles_post_ra>
// kernel: tpu_custom_call.1
= control target key start
LH: loop header
LB: loop body
LE: loop exit
PB: predicated region body
PF: predicated region fallthrough
CT: control target
= control target key end

     0   :  { %6 = vsyncpa [#allocation3], 0  ;;  %s970_s0 = inlined_call_operand.hbm [shape: f32[6,16,16], index: 0, kind: input, shape index: {}]   ;;  %s971_s1 = inlined_call_operand.hbm [shape: f32[6,18,18], index: 1, kind: output, shape index: {}]  }
   0x1   :  { %8 = vsyncpa [#allocation3 + $0x1], 0 }
   0x2   :  { %9 = vsyncpa [#allocation4], 0 }
   0x3   :  { %11 = vsyncpa [#allocation4 + $0x1], 0  ;;  %s707_s6 = smov 0   ;;  %s709_s7 = smov 0  }
   0x4   :  { %s711_s8 = smov 0   ;;  %s713_s9 = smov 0  }
   0x5 LB: > { %s728_s10 = sadd.s32 4294967295, %s687_s9   ;;  %s504_s11 = sadd.s32 4294967294, %s687_s9   ;;  %s687_s9 = sphi %s713_s9, %s983_s9   ;;  %s683_s8 = sphi %s711_s8, %s982_s8   ;;  %s679_s7 = sphi %s709_s7, %s981_s7   ;;  %s675_s6 = sphi %s707_s6, %s980_s6  }
   0x6   : > { %s732_s12 = sadd.s32 1, %s687_s9   ;;  %s24_s13 = sadd.s32 1, %s683_s8 }
   0x7   : > { %s21_s14 = ssub.s32 %s687_s9, %s732_s12  ;;  %p31_p0 = scmp.ne.s32.totalorder %s683_s8, %s679_s7 }
   0x8   : > { %p22_p1 = scmp.eq.s32.totalorder %s21_s14, 0  ;;  %p32_p2 = scmp.eq.s32.totalorder %s687_s9, 0 }
   0x9   : > { %p37_p3 = scmp.ne.s32.totalorder %s679_s7, %s675_s6  ;;  %p38_p4 = scmp.eq.s32.totalorder %s728_s10, 0 }
   0xa   : > { %s744_s15 = scalar_select %p22_p1, %s683_s8, %s24_s13  }
   0xb   : > { %p33_p5 = por %p32_p2, %p31_p0  ;;  %p746_p6 = por %p38_p4, %p37_p3 }
   0xc   : > { %p61_p7 = scmp.eq.s32.totalorder %s728_s10, 1  ;;  %p67_p8 = scmp.eq.s32.totalorder %s504_s11, 1 }
   0xd   : > { %p532_p10 = scmp.lt.s32.totalorder %s687_s9, 2  ;;  %s87_s19 = sand.u32 1, %s683_s8  }
   0xe   : > { %p753_p11 = por %p61_p7, %p31_p0  ;;  %p757_p12 = por %p67_p8, %p37_p3 }
   0xf   : > { %s515_s20 = smul.u32 768, %s687_s9  ;;  %p768_p13 = pnand %p532_p10, %p33_p5 }
  0x10   : > { %s974_s17 = scalar_select %p753_p11, 1, 0 }
  0x11   : > { %s975_s18 = scalar_select %p757_p12, 1, 0 }
  0x12   : > { %s516_s21 = smul.u32 48, %s87_s19  ;;  %s766_s24 = scalar_lea.hbm %s970_s0, %s515_s20 }
  0x13   : > { %s774_s28 = scalar_lea.sflag [#allocation3], %s87_s19  ;;  %s591_s29 = scalar_lea.hbm %s766_s24, 768 }
  0x14   : > { %s91_s26 = scalar_lea.vmem [#allocation2], %s516_s21  ;;  %p592_p0 = scmp.ne.s32.totalorder %s766_s24, %s591_s29 }
  0x15   : > { %s99_s27 = sshll.u32 %s91_s26, 4  ;;  %p593_p1 = pneg %p768_p13  ;;  %s772_s27 = int_to_ptr.vmem [resolvable:$true] %s99_s27 }
  0x16   : > { %s596_s3 = scalar_lea.hbm %s970_s0, 1536  ;;  %p597_p4 = scmp.lt.u32.totalorder %s766_s24, %s970_s0 }
  0x17   : > { %p594_p2 = pnand %p593_p1, %p592_p0  ;;  %p598_p5 = scmp.lt.u32.totalorder %s596_s3, %s591_s29 }
  0x18   : > { %p600_p8 = scmp.lt.u32.totalorder %s591_s29, %s766_s24 }
  0x19   : > { %p595_p3 = pneg %p594_p2  ;;  %p599_p7 = por %p598_p5, %p597_p4 }
  0x1b   : > { %p601_p10 = por %p600_p8, %p599_p7 }
  0x1d   : > { %p602_p9 = pnand %p601_p10, %p595_p3 }
  0x1f   : > { %605 = shalt.err (!%p602_p9)
}
  0x20   : > { %s606_s11 = scalar_lea.vmem %s772_s27, 768  ;;  %s689_s13 = smov [#allocation2]  }
  0x21   : > { %p607_p0 = scmp.ne.s32.totalorder %s772_s27, %s606_s11  ;;  %s611_s14 = sshll.u32 %s689_s13, 4  ;;  %s612_s14 = int_to_ptr.vmem [resolvable:$false] %s611_s14 }
  0x22   : > { %s613_s19 = scalar_lea.vmem %s612_s14, 1536  ;;  %p614_p11 = scmp.lt.s32.totalorder %s772_s27, %s612_s14 }
  0x23   : > { %p609_p2 = pnand %p607_p0, %p593_p1  ;;  %p615_p4 = scmp.lt.s32.totalorder %s613_s19, %s606_s11 }
  0x25   : > { %p610_p12 = pneg %p609_p2  ;;  %p616_p5 = por %p615_p4, %p614_p11 }
  0x27   : > { %p617_p7 = pnand %p616_p5, %p610_p12 }
  0x29   : > { %620 = shalt.err (!%p617_p7)
}
  0x2a   : > { %s690_s20 = smov 128   ;;  %s691_s21 = smov 8  }
  0x2b   : > { %527 = dma.hbm_to_vmem [thread:$0]  (!%p768_p13), %s766_s24, 768, %s772_s27, %s774_s28, %s690_s20, %s690_s20, %s691_s21  }
  0x2c   : > { %p509_p9 = scmp.ge.s32.totalorder %s687_s9, 1  ;;  %p107_p1 = scmp.lt.s32.totalorder %s687_s9, 3 }
  0x2e   : > { %p108_p3 = pnand %p509_p9, %p107_p1 }
  0x2f   : > { %s805_s22 = sand.u32 (!%p108_p3), 1, %s679_s7  }
  0x30   : > { %111 = sbr.rel (%p108_p3) target bundleno = 238 (0xee), region = 24  ;;  %s114_s26 = scalar_lea.sflag (!%p108_p3), [#allocation3], %s805_s22 }
  0x31   : > { %s517_s23 = smul.u32 (!%p108_p3), 48, %s805_s22 }
  0x33   : > { %s117_s29 = scalar_lea.vmem (!%p108_p3), [#allocation2], %s517_s23 }
  0x37   : > { %666 = dma.done.wait (%p746_p6), %s114_s26, 768  }
  0x38   : > { %668 = vsyncadd (%p746_p6), %s114_s26, 4294966528  ;;  %v140_v0 = vld [vmem:[%s117_s29 + $0x10] sm:$0xff]  ;;  %v138_v1 = vld [vmem:[%s117_s29] sm:$0xff]  ;;  %s692_s24 = smov 2   ;;  %vm150_vm0 = vcmask 1041408   ;;  %s693_s16 = smov 1  }
  0x39   : > { %248 = vrot.lane.b32.xlu1 %v140_v0, %s692_s24  ;;  %244 = vrot.lane.b32.xlu0 %v138_v1, %s692_s24  ;;  %v139_v2 = vld [vmem:[%s117_s29 + $0x8] sm:$0xff]  ;;  %v141_v3 = vld [vmem:[%s117_s29 + $0x18] sm:$0xff]  ;;  %v151_v5 = vrot.slane %v138_v1, 6  ;;  %v154_v10 = vrot.slane %v140_v0, 6  ;;  %vm237_vm1 = vcmask 130048   ;;  %vm262_vm2 = vcmask 15360  }
  0x3a   : > { %v152_v4 = vrot.slane %v139_v2, 6  ;;  %v143_v6 = vld [vmem:[%s117_s29 + $0x28] sm:$0xff]  ;;  %v142_v7 = vld [vmem:[%s117_s29 + $0x20] sm:$0xff]  ;;  %v155_v13 = vrot.slane %v141_v3, 6  ;;  %v240_v28 = vsel %vm237_vm1, %v140_v0, 0.0  ;;  %v238_v31 = vsel %vm237_vm1, %v138_v1, 0.0 }
  0x3b   : > { %v169_v8 = vsel %vm150_vm0, 0.0, %v151_v5  ;;  %v170_v14 = vsel %vm150_vm0, 0.0, %v154_v10  ;;  %v158_v17 = vrot.slane %v143_v6, 6  ;;  %v157_v19 = vrot.slane %v142_v7, 6  ;;  %s518_s25 = smul.u32 72, %s805_s22  ;;  %s417_s4 = scalar_lea.sflag [#allocation4], %s805_s22 }
  0x3c   : > { %v153_v9 = vsel %vm150_vm0, %v151_v5, %v152_v4  ;;  %v172_v11 = vsub.f32 %v138_v1, %v169_v8  ;;  %v174_v15 = vsub.f32 0.0, %v152_v4  ;;  %v175_v16 = vsub.f32 %v140_v0, %v170_v14  ;;  %s533_s28 = smul.u32 1152, %s728_s10  ;;  %p977_p11 = scmp.ne.s32.totalorder %s974_s17, 0 }
  0x3d   : > { %250 = vrot.lane.b32.xlu1 %v141_v3, %s692_s24  ;;  %246 = vrot.lane.b32.xlu0 %v139_v2, %s692_s24  ;;  %v173_v12 = vsub.f32 %v139_v2, %v153_v9  ;;  %v156_v18 = vsel %vm150_vm0, %v154_v10, %v155_v13  ;;  %v177_v21 = vsub.f32 0.0, %v155_v13  ;;  %v171_v22 = vsel %vm150_vm0, 0.0, %v157_v19  ;;  %s884_s27 = scalar_lea.vmem [#allocation5], %s518_s25  ;;  %s694_s11 = smov [#allocation5]  }
  0x3e   : > { %v176_v20 = vsub.f32 %v141_v3, %v156_v18  ;;  %v159_v23 = vsel %vm150_vm0, %v157_v19, %v158_v17  ;;  %v178_v24 = vsub.f32 %v142_v7, %v171_v22  ;;  %v180_v26 = vsub.f32 0.0, %v158_v17  ;;  %s431_s30 = sshll.u32 %s884_s27, 4  ;;  %s922_s3 = scalar_lea.hbm %s971_s1, %s533_s28  ;;  %s924_s30 = int_to_ptr.vmem [resolvable:$true] %s431_s30 }
  0x3f   : > { %v179_v25 = vsub.f32 %v143_v6, %v159_v23  ;;  %v241_v34 = vsel %vm237_vm1, %v141_v3, 0.0  ;;  %v239_v35 = vsel %vm237_vm1, %v139_v2, 0.0  ;;  %v243_v44 = vsel %vm237_vm1, %v143_v6, 0.0  ;;  %s621_s5 = scalar_lea.vmem %s924_s30, 1152  ;;  %s625_s13 = sshll.u32 %s694_s11, 4  ;;  %s626_s13 = int_to_ptr.vmem [resolvable:$false] %s625_s13 }
  0x40   : > { %v242_v45 = vsel %vm237_vm1, %v142_v7, 0.0  ;;  %vm281_vm3 = vcmask 1040384   ;;  %vm217_vm4 = vcmask 7168   ;;  %vm227_vm5 = vcmask 138240   ;;  %p622_p6 = scmp.ne.s32.totalorder %s924_s30, %s621_s5  ;;  %s627_s14 = scalar_lea.vmem %s626_s13, 2304 }
  0x41   : > { %254 = vrot.lane.b32.xlu1 %v143_v6, %s692_s24  ;;  %252 = vrot.lane.b32.xlu0 %v142_v7, %s692_s24  ;;  %vm405_vm6 = vcmask 146432   ;;  %vm408_vm11 = vcmask 140288   ;;  %p628_p8 = scmp.lt.s32.totalorder %s924_s30, %s626_s13  ;;  %p629_p10 = scmp.lt.s32.totalorder %s627_s14, %s621_s5 }
  0x42   : > { %p623_p12 = pnand %p622_p6, %p977_p11 }
  0x43   : > { %p630_p0 = por %p629_p10, %p628_p8 }
  0x44   : > { %p624_p13 = pneg %p623_p12 }
  0x45   : > { %190 = vrot.lane.b32.xlu0 %v172_v11, %s693_s16  ;;  %192 = vrot.lane.b32.xlu1 %v173_v12, %s693_s16 }
  0x46   : > { %p631_p2 = pnand %p630_p0, %p624_p13 }
  0x49   : > { %194 = vrot.lane.b32.xlu0 %v174_v15, %s693_s16  ;;  %196 = vrot.lane.b32.xlu1 %v175_v16, %s693_s16 }
  0x4d   : > { %198 = vrot.lane.b32.xlu0 %v176_v20, %s693_s16  ;;  %200 = vrot.lane.b32.xlu1 %v177_v21, %s693_s16 }
  0x51   : > { %202 = vrot.lane.b32.xlu0 %v178_v24, %s693_s16  ;;  %204 = vrot.lane.b32.xlu1 %v179_v25, %s693_s16 }
  0x55   : > { %206 = vrot.lane.b32.xlu0 %v180_v26, %s693_s16 }
  0xab   : > { %v249_v27 = vpop.permute.xlu1 %248  ;;  %v245_v29 = vpop.permute.xlu0 %244 }
  0xac   : > { %v265_v30 = vsel %vm262_vm2, 0.0, %v249_v27  ;;  %v263_v32 = vsel %vm262_vm2, 0.0, %v245_v29 }
  0xad   : > { %v271_v33 = vsub.f32 %v240_v28, %v265_v30  ;;  %v269_v36 = vsub.f32 %v238_v31, %v263_v32 }
  0xaf   : > { %v251_v37 = vpop.permute.xlu1 %250  ;;  %v247_v38 = vpop.permute.xlu0 %246  ;;  %v285_v43 = vrot.slane %v271_v33, 7  ;;  %v282_v46 = vrot.slane %v269_v36, 7 }
  0xb0   : > { %v266_v39 = vsel %vm262_vm2, 0.0, %v251_v37  ;;  %v264_v40 = vsel %vm262_vm2, 0.0, %v247_v38 }
  0xb1   : > { %v272_v41 = vsub.f32 %v241_v34, %v266_v39  ;;  %v270_v42 = vsub.f32 %v239_v35, %v264_v40  ;;  %v300_v57 = vsel %vm281_vm3, 0.0, %v282_v46  ;;  %v301_v13 = vsel %vm281_vm3, 0.0, %v285_v43 }
  0xb2   : > { %v315_v2 = vmul.f32 %v300_v57, %v300_v57  ;;  %v318_v23 = vmul.f32 %v301_v13, %v301_v13 }
  0xb3   : > { %v286_v47 = vrot.slane %v272_v41, 7  ;;  %v283_v48 = vrot.slane %v270_v42, 7  ;;  %v255_v49 = vpop.permute.xlu1 %254  ;;  %v253_v50 = vpop.permute.xlu0 %252 }
  0xb4   : > { %v268_v51 = vsel %vm262_vm2, 0.0, %v255_v49  ;;  %v267_v52 = vsel %vm262_vm2, 0.0, %v253_v50 }
  0xb5   : > { %v274_v53 = vsub.f32 %v243_v44, %v268_v51  ;;  %v273_v54 = vsub.f32 %v242_v45, %v267_v52  ;;  %v284_v55 = vsel %vm281_vm3, %v282_v46, %v283_v48  ;;  %v287_v56 = vsel %vm281_vm3, %v285_v43, %v286_v47 }
  0xb6   : > { %v316_v4 = vmul.f32 %v284_v55, %v284_v55  ;;  %v303_v14 = vsel %vm281_vm3, %v283_v48, 0.0  ;;  %v304_v25 = vsel %vm281_vm3, %v286_v47, 0.0  ;;  %v319_v43 = vmul.f32 %v287_v56, %v287_v56 }
  0xb7   : > { %v289_v58 = vrot.slane %v274_v53, 7  ;;  %v288_v59 = vrot.slane %v273_v54, 7  ;;  %v191_v60 = vpop.permute.xlu0 %190  ;;  %v193_v61 = vpop.permute.xlu1 %192  ;;  %v317_v24 = vmul.f32 %v303_v14, %v303_v14  ;;  %v320_v42 = vmul.f32 %v304_v25, %v304_v25 }
  0xb8   : > { %v218_v62 = vsel %vm217_vm4, 0.0, %v191_v60  ;;  %v219_v63 = vsel %vm217_vm4, 0.0, %v193_v61 }
  0xb9   : > { %v228_v0 = vsel %vm227_vm5, %v218_v62, 0.0  ;;  %v229_v1 = vsel %vm227_vm5, %v219_v63, 0.0  ;;  %v290_v8 = vsel %vm281_vm3, %v288_v59, %v289_v58  ;;  %v305_v30 = vsel %vm281_vm3, %v289_v58, 0.0 }
  0xba   : > { %v306_v3 = vmul.f32 %v228_v0, %v228_v0  ;;  %v307_v5 = vmul.f32 %v229_v1, %v229_v1  ;;  %v302_v31 = vsel %vm281_vm3, 0.0, %v288_v59  ;;  %v323_v44 = vmul.f32 %v305_v30, %v305_v30 }
  0xbb   : > { %v195_v6 = vpop.permute.xlu0 %194  ;;  %v197_v7 = vpop.permute.xlu1 %196  ;;  %v321_v45 = vmul.f32 %v302_v31, %v302_v31  ;;  %v322_v52 = vmul.f32 %v290_v8, %v290_v8 }
  0xbc   : > { %v324_v9 = vadd.f32 %v315_v2, %v306_v3  ;;  %v325_v10 = vadd.f32 %v316_v4, %v307_v5  ;;  %v220_v11 = vsel %vm217_vm4, 0.0, %v195_v6  ;;  %v221_v12 = vsel %vm217_vm4, 0.0, %v197_v7 }
  0xbd   : > { %v230_v15 = vsel %vm227_vm5, %v220_v11, 0.0  ;;  %v231_v16 = vsel %vm227_vm5, %v221_v12, 0.0 }
  0xbe   : > { %v845_v17 = vadd.f32 1e-06, %v324_v9  ;;  %v847_v18 = vadd.f32 1e-06, %v325_v10  ;;  %v308_v19 = vmul.f32 %v230_v15, %v230_v15  ;;  %v309_v20 = vmul.f32 %v231_v16, %v231_v16 }
  0xbf   : > { %v199_v21 = vpop.permute.xlu0 %198  ;;  %v201_v22 = vpop.permute.xlu1 %200 }
  0xc0   : > { %573 = vrsqrt.f32 %v845_v17  ;;  %v326_v26 = vadd.f32 %v317_v24, %v308_v19  ;;  %v327_v27 = vadd.f32 %v318_v23, %v309_v20  ;;  %v222_v28 = vsel %vm217_vm4, 0.0, %v199_v21 }
  0xc1   : > { %575 = vrsqrt.f32 %v847_v18  ;;  %v223_v29 = vsel %vm217_vm4, 0.0, %v201_v22  ;;  %v232_v32 = vsel %vm227_vm5, %v222_v28, 0.0  ;;  %vm344_vm7 = vcmp.eq.f32.partialorder %v845_v17, inf }
  0xc2   : > { %v233_v33 = vsel %vm227_vm5, %v223_v29, 0.0  ;;  %v858_v36 = vadd.f32 1e-06, %v326_v26  ;;  %v860_v37 = vadd.f32 1e-06, %v327_v27  ;;  %v310_v38 = vmul.f32 %v232_v32, %v232_v32 }
  0xc3   : > { %v203_v34 = vpop.permute.xlu0 %202  ;;  %v205_v35 = vpop.permute.xlu1 %204  ;;  %v311_v39 = vmul.f32 %v233_v33, %v233_v33  ;;  %vm346_vm8 = vcmp.eq.f32.partialorder %v845_v17, 0.0  ;;  %v347_v0 = vand.u32 2147483648, %v845_v17  ;;  %vm351_vm9 = vcmp.eq.f32.partialorder %v847_v18, inf }
  0xc4   : > { %v224_v40 = vsel %vm217_vm4, 0.0, %v203_v34  ;;  %v225_v41 = vsel %vm217_vm4, 0.0, %v205_v35  ;;  %577 = vrsqrt.f32 %v858_v36  ;;  %v328_v47 = vadd.f32 %v319_v43, %v310_v38 }
  0xc5   : > { %579 = vrsqrt.f32 %v860_v37  ;;  %v329_v48 = vadd.f32 %v320_v42, %v311_v39  ;;  %v234_v49 = vsel %vm227_vm5, %v224_v40, 0.0  ;;  %v235_v50 = vsel %vm227_vm5, %v225_v41, 0.0 }
  0xc6   : > { %v312_v51 = vmul.f32 %v234_v49, %v234_v49  ;;  %v313_v53 = vmul.f32 %v235_v50, %v235_v50  ;;  %v337_v56 = vadd.f32 1e-06, %v328_v47  ;;  %v354_v3 = vand.u32 2147483648, %v847_v18 }
  0xc7   : > { %v207_v46 = vpop.permute.xlu0 %206  ;;  %v871_v57 = vadd.f32 1e-06, %v329_v48  ;;  %vm353_vm10 = vcmp.eq.f32.partialorder %v847_v18, 0.0  ;;  %vm358_vm12 = vcmp.eq.f32.partialorder %v858_v36, inf  ;;  %vm360_vm13 = vcmp.eq.f32.partialorder %v858_v36, 0.0 }
  0xc8   : > { %v226_v54 = vsel %vm217_vm4, 0.0, %v207_v46  ;;  %v330_v61 = vadd.f32 %v321_v45, %v312_v51  ;;  %v331_v62 = vadd.f32 %v322_v52, %v313_v53  ;;  %581 = vrsqrt.f32 %v337_v56 }
  0xc9   : > { %v236_v58 = vsel %vm227_vm5, %v226_v54, 0.0  ;;  %583 = vrsqrt.f32 %v871_v57  ;;  %v361_v13 = vand.u32 2147483648, %v858_v36  ;;  %vm365_vm14 = vcmp.eq.f32.partialorder %v860_v37, inf }
  0xca   : > { %v574_v55 = vpop.eup %573  ;;  %v314_v63 = vmul.f32 %v236_v58, %v236_v58  ;;  %v339_v7 = vadd.f32 1e-06, %v330_v61  ;;  %v340_v8 = vadd.f32 1e-06, %v331_v62  ;;  %v368_v16 = vand.u32 2147483648, %v860_v37 }
  0xcb   : > { %v576_v59 = vpop.eup %575  ;;  %v343_v60 = vmul.f32 %v574_v55, %v845_v17  ;;  %vm367_vm15 = vcmp.eq.f32.partialorder %v860_v37, 0.0  ;;  %vm372_vm0 = vcmp.eq.f32.partialorder %v337_v56, inf  ;;  %v375_v24 = vand.u32 2147483648, %v337_v56 }
  0xcc   : > { %v350_v1 = vmul.f32 %v576_v59, %v847_v18  ;;  %v332_v9 = vadd.f32 %v323_v44, %v314_v63  ;;  %585 = vrsqrt.f32 %v339_v7  ;;  %vm374_vm1 = vcmp.eq.f32.partialorder %v337_v56, 0.0 }
  0xcd   : > { %v345_v2 = vsel %vm344_vm7, %v845_v17, %v343_v60  ;;  %587 = vrsqrt.f32 %v340_v8  ;;  %vm379_vm2 = vcmp.eq.f32.partialorder %v871_v57, inf  ;;  %v382_v27 = vand.u32 2147483648, %v871_v57 }
  0xce   : > { %v348_v4 = vsel %vm346_vm8, %v347_v0, %v345_v2  ;;  %v352_v5 = vsel %vm351_vm9, %v847_v18, %v350_v1  ;;  %v578_v10 = vpop.eup %577  ;;  %v341_v17 = vadd.f32 1e-06, %v332_v9  ;;  %vm381_vm3 = vcmp.eq.f32.partialorder %v871_v57, 0.0 }
  0xcf   : > { %406 = vst.msk [vmem:[%s884_s27] sm:$0xff] %vm405_vm6, %v348_v4  ;;  %v355_v6 = vsel %vm353_vm10, %v354_v3, %v352_v5  ;;  %v580_v11 = vpop.eup %579  ;;  %v357_v12 = vmul.f32 %v578_v10, %v858_v36  ;;  %vm386_vm4 = vcmp.eq.f32.partialorder %v339_v7, inf  ;;  %v389_v34 = vand.u32 2147483648, %v339_v7 }
  0xd0   : > { %407 = vst.msk [vmem:[%s884_s27 + $0x8] sm:$0xff] %vm405_vm6, %v355_v6  ;;  %v364_v14 = vmul.f32 %v580_v11, %v860_v37  ;;  %589 = vrsqrt.f32 %v341_v17  ;;  %vm388_vm5 = vcmp.eq.f32.partialorder %v339_v7, 0.0  ;;  %vm393_vm7 = vcmp.eq.f32.partialorder %v340_v8, inf }
  0xd1   : > { %v359_v15 = vsel %vm358_vm12, %v858_v36, %v357_v12  ;;  %vm395_vm8 = vcmp.eq.f32.partialorder %v340_v8, 0.0  ;;  %vm400_vm9 = vcmp.eq.f32.partialorder %v341_v17, inf  ;;  %v403_v43 = vand.u32 2147483648, %v341_v17 }
  0xd2   : > { %v362_v18 = vsel %vm360_vm13, %v361_v13, %v359_v15  ;;  %v366_v19 = vsel %vm365_vm14, %v860_v37, %v364_v14  ;;  %v582_v21 = vpop.eup %581  ;;  %v396_v37 = vand.u32 2147483648, %v340_v8  ;;  %vm402_vm10 = vcmp.eq.f32.partialorder %v341_v17, 0.0 }
  0xd3   : > { %409 = vst.msk [vmem:[%s884_s27 + $0x10] sm:$0x3] %vm408_vm11, %v362_v18  ;;  %v369_v20 = vsel %vm367_vm15, %v368_v16, %v366_v19  ;;  %v584_v22 = vpop.eup %583  ;;  %v371_v23 = vmul.f32 %v582_v21, %v337_v56 }
  0xd4   : > { %410 = vst.msk [vmem:[%s884_s27 + $0x18] sm:$0xff] %vm405_vm6, %v369_v20  ;;  %v378_v25 = vmul.f32 %v584_v22, %v871_v57 }
  0xd5   : > { %v373_v26 = vsel %vm372_vm0, %v337_v56, %v371_v23 }
  0xd6   : > { %v376_v28 = vsel %vm374_vm1, %v375_v24, %v373_v26  ;;  %v380_v29 = vsel %vm379_vm2, %v871_v57, %v378_v25  ;;  %v586_v30 = vpop.eup %585 }
  0xd7   : > { %411 = vst.msk [vmem:[%s884_s27 + $0x20] sm:$0xff] %vm405_vm6, %v376_v28  ;;  %v383_v31 = vsel %vm381_vm3, %v382_v27, %v380_v29  ;;  %v588_v32 = vpop.eup %587  ;;  %v385_v33 = vmul.f32 %v586_v30, %v339_v7 }
  0xd8   : > { %412 = vst.msk [vmem:[%s884_s27 + $0x28] sm:$0x3] %vm408_vm11, %v383_v31  ;;  %v392_v35 = vmul.f32 %v588_v32, %v340_v8 }
  0xd9   : > { %v387_v36 = vsel %vm386_vm4, %v339_v7, %v385_v33 }
  0xda   : > { %v590_v38 = vpop.eup %589  ;;  %v390_v39 = vsel %vm388_vm5, %v389_v34, %v387_v36  ;;  %v394_v40 = vsel %vm393_vm7, %v340_v8, %v392_v35 }
  0xdb   : > { %413 = vst.msk [vmem:[%s884_s27 + $0x30] sm:$0xff] %vm405_vm6, %v390_v39  ;;  %v397_v41 = vsel %vm395_vm8, %v396_v37, %v394_v40  ;;  %v399_v42 = vmul.f32 %v590_v38, %v341_v17 }
  0xdc   : > { %414 = vst.msk [vmem:[%s884_s27 + $0x38] sm:$0xff] %vm405_vm6, %v397_v41 }
  0xdd   : > { %v401_v44 = vsel %vm400_vm9, %v341_v17, %v399_v42 }
  0xde   : > { %v404_v45 = vsel %vm402_vm10, %v403_v43, %v401_v44 }
  0xdf   : > { %415 = vst.msk [vmem:[%s884_s27 + $0x40] sm:$0x3] %vm408_vm11, %v404_v45 }
  0xe0   : > { %634 = shalt.err (!%p631_p2)
}
  0xe1   : > { %s635_s19 = scalar_lea.hbm %s922_s3, 1152  ;;  %s639_s23 = scalar_lea.hbm %s971_s1, 2304 }
  0xe2   : > { %p636_p4 = scmp.ne.s32.totalorder %s922_s3, %s635_s19  ;;  %p640_p9 = scmp.lt.u32.totalorder %s922_s3, %s971_s1 }
  0xe3   : > { %p641_p1 = scmp.lt.u32.totalorder %s639_s23, %s635_s19  ;;  %p643_p6 = scmp.lt.u32.totalorder %s635_s19, %s922_s3 }
  0xe4   : > { %p637_p5 = pnand %p636_p4, %p977_p11 }
  0xe5   : > { %p642_p3 = por %p641_p1, %p640_p9 }
  0xe6   : > { %p638_p7 = pneg %p637_p5 }
  0xe7   : > { %p644_p12 = por %p643_p6, %p642_p3 }
  0xe9   : > { %p645_p13 = pnand %p644_p12, %p638_p7 }
  0xeb   : > { %648 = shalt.err (!%p645_p13)
}
  0xec   : > { %s695_s24 = smov 128   ;;  %s696_s16 = smov 8  }
  0xed   : > { %522 = dma.vmem_to_hbm [thread:$0]  (%p977_p11), %s924_s30, 1152, %s922_s3, %s417_s4, %s695_s24, %s695_s24, %s696_s16  }
  0xee PF: > { %s446_s25 = sand.u32 1, %s675_s6   ;;  %p978_p8 = scmp.ne.s32.totalorder %s975_s18, 0 }
  0xef   : > { %p979_p10 = scmp.ge.s32.totalorder %s687_s9, 2  ;;  %s447_s27 = scalar_lea.sflag [#allocation4], %s446_s25 }
  0xf1   : > { %p529_p0 = pnand %p979_p10, %p978_p8 }
  0xf3   : > { %670 = dma.done.wait (!%p529_p0), %s447_s27, 1152  }
  0xf4   : > { %672 = vsyncadd (!%p529_p0), %s447_s27, 4294966144  ;;  %p14_p2 = scmp.ge.s32.totalorder %s732_s12, 4   ;;  %s980_s6 = smov %s679_s7 }
  0xf5   : > { %s981_s7 = smov %s683_s8  ;;  %s982_s8 = smov %s744_s15 }
  0xf6   : > { %s983_s9 = smov %s732_s12  ;;  %16 = sbr.rel (!%p14_p2) target bundleno = 5 (0x5), region = 69 }
  0xfd   :  { %452 = vsyncpa [#allocation3], 1 }
  0xfe   :  { %454 = vsyncpa [#allocation3 + $0x1], 1 }
  0xff   :  { %455 = vsyncpa [#allocation4], 1 }
 0x100   :  { %457 = vsyncpa [#allocation4 + $0x1], 1 }

</bundles_post_ra>
